<compile_context>
chip_gen: v5e
topology: v5e:2x2
jax: 0.10.0
libtpu: 0.0.40
codegen_flags: <defaults>
</compile_context>

<pallas_src>
import jax
import jax.numpy as jnp
from jax.experimental import pallas as pl
from jax.experimental.pallas import tpu as pltpu


def _reduce_state_kernel(h_ref, c_ref, wh_ref, wc_ref, bh_ref, bc_ref,
                         oh_ref, oc_ref):
    # h_ref, c_ref : (2, B, H) f32     wh_ref, wc_ref : (2, H, H) bf16
    # b*_ref       : (1, H)    f32     o*_ref         : (1, B, H) f32
    #
    # Split-K over the bi-LSTM direction axis:
    #   [h0 | h1] @ [[W0], [W1]] = h0 @ W0 + h1 @ W1
    # which makes PyTorch's transpose(0,1).contiguous().view(B, 2H) a no-op.
    yh = (jnp.dot(h_ref[0].astype(jnp.bfloat16), wh_ref[0],
                  preferred_element_type=jnp.float32)
          + jnp.dot(h_ref[1].astype(jnp.bfloat16), wh_ref[1],
                    preferred_element_type=jnp.float32)
          + bh_ref[...])
    oh_ref[0] = jnp.maximum(yh, 0.0).astype(oh_ref.dtype)

    yc = (jnp.dot(c_ref[0].astype(jnp.bfloat16), wc_ref[0],
                  preferred_element_type=jnp.float32)
          + jnp.dot(c_ref[1].astype(jnp.bfloat16), wc_ref[1],
                    preferred_element_type=jnp.float32)
          + bc_ref[...])
    oc_ref[0] = jnp.maximum(yc, 0.0).astype(oc_ref.dtype)


def _nbytes(x):
    return x.size * x.dtype.itemsize


def reduce_state_fused(h, c, w_h, w_c, b_h, b_c):
    """h, c: (2, B, H); w_*: (2, H, H) bf16; b_*: (1, H) f32.

    Returns (reduced_h, reduced_c), each (1, B, H) in h.dtype.
    """
    _, B, H = h.shape
    out_sds = jax.ShapeDtypeStruct((1, B, H), h.dtype)
    vmem = pl.BlockSpec(memory_space=pltpu.MemorySpace.VMEM)  # whole array, VMEM-resident

    operands = (h, c, w_h, w_c, b_h, b_c)
    out_bytes = 2 * B * H * h.dtype.itemsize
    io_bytes = sum(_nbytes(x) for x in operands) + out_bytes
    # Whole-array residency + double-buffer headroom; floor at 32 MiB (safe on
    # every generation), cap at v7x's 64 MiB physical VMEM.
    vmem_limit = int(min(64 * 1024 * 1024,
                         max(32 * 1024 * 1024, 2 * io_bytes + (1 << 20))))

    cost = pl.CostEstimate(
        flops=2 * (2 * B * (2 * H) * H),  # two (B,2H)@(2H,H) GEMMs
        transcendentals=0,
        bytes_accessed=io_bytes,
    )

    return pl.pallas_call(
        _reduce_state_kernel,
        out_shape=(out_sds, out_sds),
        in_specs=[vmem] * 6,
        out_specs=(vmem, vmem),
        compiler_params=pltpu.CompilerParams(vmem_limit_bytes=vmem_limit),
        cost_estimate=cost,
    )(*operands)


class ReduceState:
    """JAX/Pallas port of training_ptr_gen.model.ReduceState (forward only)."""

    def __init__(self, hidden_dim, key):
        k1, k2, k3, k4 = jax.random.split(key, 4)
        std = 1e-4  # config.trunc_norm_init_std in pointer-gen
        H = hidden_dim
        # PyTorch Linear stores weight as (out=H, in=2H). We keep the transposed
        # (in, out) layout, pre-split over the INPUT-feature axis into (2, H, H)
        # (== W_pt.T.reshape(2, H, H)): w[d] multiplies direction-d of the
        # bi-LSTM state, so the kernel does a split-K matmul and the
        # transpose(0,1).view(B, 2H) is free.  Weights live in bf16 (MXU-native,
        # half the DMA bytes); biases stay f32 (added to the f32 accumulator).
        self.w_h = (std * jax.random.normal(k1, (2, H, H))).astype(jnp.bfloat16)
        self.b_h = (std * jax.random.normal(k2, (1, H))).astype(jnp.float32)
        self.w_c = (std * jax.random.normal(k3, (2, H, H))).astype(jnp.bfloat16)
        self.b_c = (std * jax.random.normal(k4, (1, H))).astype(jnp.float32)
        self.hidden_dim = H

    def __call__(self, hidden):
        h, c = hidden  # each (2, B, H)
        # Kernel emits the (1, B, H) outputs directly -- no wrapper glue.
        return reduce_state_fused(h, c, self.w_h, self.w_c, self.b_h, self.b_c)


def _reference(hidden, mod):
    # Pure-JAX reference with the SAME operand precision as the kernel
    # (bf16 matmul operands, f32 accumulation), mirroring the PyTorch math:
    #   relu(Linear(transpose(0,1).contiguous().view(B, 2H)))
    h, c = hidden
    B = h.shape[1]
    H = mod.hidden_dim
    w_h = jnp.concatenate([mod.w_h[0], mod.w_h[1]], axis=0)  # (2H, H) bf16
    w_c = jnp.concatenate([mod.w_c[0], mod.w_c[1]], axis=0)  # (2H, H) bf16
    h_in = jnp.transpose(h, (1, 0, 2)).reshape(B, 2 * H).astype(jnp.bfloat16)
    c_in = jnp.transpose(c, (1, 0, 2)).reshape(B, 2 * H).astype(jnp.bfloat16)
    rh = jnp.maximum(
        jnp.dot(h_in, w_h, preferred_element_type=jnp.float32) + mod.b_h, 0.0)
    rc = jnp.maximum(
        jnp.dot(c_in, w_c, preferred_element_type=jnp.float32) + mod.b_c, 0.0)
    return rh[None, ...].astype(h.dtype), rc[None, ...].astype(c.dtype)


if __name__ == "__main__":
    key = jax.random.PRNGKey(0)
    k_param, k_h, k_c = jax.random.split(key, 3)

    hidden_dim = 32
    batch = 8

    mod = ReduceState(hidden_dim, k_param)

    h = jax.random.normal(k_h, (2, batch, hidden_dim), dtype=jnp.float32)
    c = jax.random.normal(k_c, (2, batch, hidden_dim), dtype=jnp.float32)

    out_h, out_c = mod((h, c))
    out_h, out_c = jax.block_until_ready((out_h, out_c))

    ref_h, ref_c = _reference((h, c), mod)

    assert out_h.shape == (1, batch, hidden_dim)
    assert out_c.shape == (1, batch, hidden_dim)
    assert out_h.dtype == h.dtype and out_c.dtype == c.dtype
    assert jnp.allclose(out_h, ref_h, atol=1e-5, rtol=1e-5)
    assert jnp.allclose(out_c, ref_c, atol=1e-5, rtol=1e-5)

    print("KERNEL_OK")
</pallas_src>

<mosaic_0001>
module attributes {stable_mosaic.version = 11 : i64} {
  func.func @_reduce_state_kernel(%arg0: memref<2x8x32xf32, #tpu.memory_space<vmem>>, %arg1: memref<2x8x32xf32, #tpu.memory_space<vmem>>, %arg2: memref<2x32x32xbf16, #tpu.memory_space<vmem>>, %arg3: memref<2x32x32xbf16, #tpu.memory_space<vmem>>, %arg4: memref<1x32xf32, #tpu.memory_space<vmem>>, %arg5: memref<1x32xf32, #tpu.memory_space<vmem>>, %arg6: memref<1x8x32xf32, #tpu.memory_space<vmem>>, %arg7: memref<1x8x32xf32, #tpu.memory_space<vmem>>) attributes {dimension_semantics = [], scalar_prefetch = 0 : i64, scratch_operands = 0 : i64, tpu.core_type = #tpu.core_type<tc>} {
    %c0 = arith.constant 0 : index
    %c0_0 = arith.constant 0 : index
    %c0_1 = arith.constant 0 : index
    %0 = vector.load %arg0[%c0, %c0_0, %c0_1] : memref<2x8x32xf32, #tpu.memory_space<vmem>>, vector<1x8x32xf32>
    %1 = vector.shape_cast %0 : vector<1x8x32xf32> to vector<8x32xf32>
    %2 = arith.truncf %1 : vector<8x32xf32> to vector<8x32xbf16>
    %c0_2 = arith.constant 0 : index
    %c0_3 = arith.constant 0 : index
    %c0_4 = arith.constant 0 : index
    %3 = vector.load %arg2[%c0_2, %c0_3, %c0_4] : memref<2x32x32xbf16, #tpu.memory_space<vmem>>, vector<1x32x32xbf16>
    %4 = vector.shape_cast %3 : vector<1x32x32xbf16> to vector<32x32xbf16>
    %cst = arith.constant dense<0.000000e+00> : vector<8x32xf32>
    %5 = tpu.matmul %2, %4, %cst {dimension_numbers = #tpu.dot_dimension_numbers<[1], [0], [0], [1], [0, 0, 1, 1], [], []>} : vector<8x32xbf16>, vector<32x32xbf16>, vector<8x32xf32> -> vector<8x32xf32>
    %c1 = arith.constant 1 : index
    %c0_5 = arith.constant 0 : index
    %c0_6 = arith.constant 0 : index
    %6 = vector.load %arg0[%c1, %c0_5, %c0_6] : memref<2x8x32xf32, #tpu.memory_space<vmem>>, vector<1x8x32xf32>
    %7 = vector.shape_cast %6 : vector<1x8x32xf32> to vector<8x32xf32>
    %8 = arith.truncf %7 : vector<8x32xf32> to vector<8x32xbf16>
    %c1_7 = arith.constant 1 : index
    %c0_8 = arith.constant 0 : index
    %c0_9 = arith.constant 0 : index
    %9 = vector.load %arg2[%c1_7, %c0_8, %c0_9] : memref<2x32x32xbf16, #tpu.memory_space<vmem>>, vector<1x32x32xbf16>
    %10 = vector.shape_cast %9 : vector<1x32x32xbf16> to vector<32x32xbf16>
    %cst_10 = arith.constant dense<0.000000e+00> : vector<8x32xf32>
    %11 = tpu.matmul %8, %10, %cst_10 {dimension_numbers = #tpu.dot_dimension_numbers<[1], [0], [0], [1], [0, 0, 1, 1], [], []>} : vector<8x32xbf16>, vector<32x32xbf16>, vector<8x32xf32> -> vector<8x32xf32>
    %12 = arith.addf %5, %11 : vector<8x32xf32>
    %c0_11 = arith.constant 0 : index
    %c0_12 = arith.constant 0 : index
    %13 = vector.load %arg4[%c0_11, %c0_12] : memref<1x32xf32, #tpu.memory_space<vmem>>, vector<1x32xf32>
    %14 = vector.broadcast %13 : vector<1x32xf32> to vector<8x32xf32>
    %15 = arith.addf %12, %14 : vector<8x32xf32>
    %cst_13 = arith.constant 0.000000e+00 : f32
    %16 = vector.broadcast %cst_13 : f32 to vector<8x32xf32>
    %17 = arith.maximumf %15, %16 : vector<8x32xf32>
    %c0_14 = arith.constant 0 : index
    %c0_15 = arith.constant 0 : index
    %c0_16 = arith.constant 0 : index
    %18 = vector.load %arg6[%c0_14, %c0_15, %c0_16] : memref<1x8x32xf32, #tpu.memory_space<vmem>>, vector<1x8x32xf32>
    %19 = vector.shape_cast %18 : vector<1x8x32xf32> to vector<8x32xf32>
    %20 = vector.shape_cast %17 : vector<8x32xf32> to vector<1x8x32xf32>
    tpu.vector_store %arg6[%c0_14, %c0_15, %c0_16], %20 {strides = array<i32>} : memref<1x8x32xf32, #tpu.memory_space<vmem>>, vector<1x8x32xf32>,
    %c0_17 = arith.constant 0 : index
    %c0_18 = arith.constant 0 : index
    %c0_19 = arith.constant 0 : index
    %21 = vector.load %arg1[%c0_17, %c0_18, %c0_19] : memref<2x8x32xf32, #tpu.memory_space<vmem>>, vector<1x8x32xf32>
    %22 = vector.shape_cast %21 : vector<1x8x32xf32> to vector<8x32xf32>
    %23 = arith.truncf %22 : vector<8x32xf32> to vector<8x32xbf16>
    %c0_20 = arith.constant 0 : index
    %c0_21 = arith.constant 0 : index
    %c0_22 = arith.constant 0 : index
    %24 = vector.load %arg3[%c0_20, %c0_21, %c0_22] : memref<2x32x32xbf16, #tpu.memory_space<vmem>>, vector<1x32x32xbf16>
    %25 = vector.shape_cast %24 : vector<1x32x32xbf16> to vector<32x32xbf16>
    %cst_23 = arith.constant dense<0.000000e+00> : vector<8x32xf32>
    %26 = tpu.matmul %23, %25, %cst_23 {dimension_numbers = #tpu.dot_dimension_numbers<[1], [0], [0], [1], [0, 0, 1, 1], [], []>} : vector<8x32xbf16>, vector<32x32xbf16>, vector<8x32xf32> -> vector<8x32xf32>
    %c1_24 = arith.constant 1 : index
    %c0_25 = arith.constant 0 : index
    %c0_26 = arith.constant 0 : index
    %27 = vector.load %arg1[%c1_24, %c0_25, %c0_26] : memref<2x8x32xf32, #tpu.memory_space<vmem>>, vector<1x8x32xf32>
    %28 = vector.shape_cast %27 : vector<1x8x32xf32> to vector<8x32xf32>
    %29 = arith.truncf %28 : vector<8x32xf32> to vector<8x32xbf16>
    %c1_27 = arith.constant 1 : index
    %c0_28 = arith.constant 0 : index
    %c0_29 = arith.constant 0 : index
    %30 = vector.load %arg3[%c1_27, %c0_28, %c0_29] : memref<2x32x32xbf16, #tpu.memory_space<vmem>>, vector<1x32x32xbf16>
    %31 = vector.shape_cast %30 : vector<1x32x32xbf16> to vector<32x32xbf16>
    %cst_30 = arith.constant dense<0.000000e+00> : vector<8x32xf32>
    %32 = tpu.matmul %29, %31, %cst_30 {dimension_numbers = #tpu.dot_dimension_numbers<[1], [0], [0], [1], [0, 0, 1, 1], [], []>} : vector<8x32xbf16>, vector<32x32xbf16>, vector<8x32xf32> -> vector<8x32xf32>
    %33 = arith.addf %26, %32 : vector<8x32xf32>
    %c0_31 = arith.constant 0 : index
    %c0_32 = arith.constant 0 : index
    %34 = vector.load %arg5[%c0_31, %c0_32] : memref<1x32xf32, #tpu.memory_space<vmem>>, vector<1x32xf32>
    %35 = vector.broadcast %34 : vector<1x32xf32> to vector<8x32xf32>
    %36 = arith.addf %33, %35 : vector<8x32xf32>
    %cst_33 = arith.constant 0.000000e+00 : f32
    %37 = vector.broadcast %cst_33 : f32 to vector<8x32xf32>
    %38 = arith.maximumf %36, %37 : vector<8x32xf32>
    %c0_34 = arith.constant 0 : index
    %c0_35 = arith.constant 0 : index
    %c0_36 = arith.constant 0 : index
    %39 = vector.load %arg7[%c0_34, %c0_35, %c0_36] : memref<1x8x32xf32, #tpu.memory_space<vmem>>, vector<1x8x32xf32>
    %40 = vector.shape_cast %39 : vector<1x8x32xf32> to vector<8x32xf32>
    %41 = vector.shape_cast %38 : vector<8x32xf32> to vector<1x8x32xf32>
    tpu.vector_store %arg7[%c0_34, %c0_35, %c0_36], %41 {strides = array<i32>} : memref<1x8x32xf32, #tpu.memory_space<vmem>>, vector<1x8x32xf32>,
    return
  }
}

</mosaic_0001>

<bundles_post_ra>
// kernel: tpu_custom_call.1
= control target key start
LH: loop header
LB: loop body
LE: loop exit
PB: predicated region body
PF: predicated region fallthrough
CT: control target
= control target key end

     0   :  { %13 = vsyncpa [#allocation3], 0  ;;  %s571_s0 = inlined_call_operand.hbm [shape: f32[2,8,32], index: 0, kind: input, shape index: {}]   ;;  %s572_s1 = inlined_call_operand.hbm [shape: f32[2,8,32], index: 1, kind: input, shape index: {}]   ;;  %s573_s2 = inlined_call_operand.hbm [shape: bf16[2,32,32], index: 2, kind: input, shape index: {}]   ;;  %s574_s3 = inlined_call_operand.hbm [shape: bf16[2,32,32], index: 3, kind: input, shape index: {}]   ;;  %s575_s4 = inlined_call_operand.vmem [shape: f32[1,32], index: 4, kind: input, shape index: {}]   ;;  %s576_s5 = inlined_call_operand.vmem [shape: f32[1,32], index: 5, kind: input, shape index: {}]   ;;  %s577_s6 = inlined_call_operand.hbm [shape: f32[1,8,32], index: 6, kind: output, shape index: {0}]   ;;  %s578_s7 = inlined_call_operand.hbm [shape: f32[1,8,32], index: 7, kind: output, shape index: {1}]  }
   0x1   :  { %14 = vsyncpa [#allocation6], 0 }
   0x2   :  { %15 = vsyncpa [#allocation9], 0 }
   0x3   :  { %16 = vsyncpa [#allocation4], 0 }
   0x4   :  { %17 = vsyncpa [#allocation12], 0  ;;  %s35_s26 = sshll.u32 %s572_s1, 4  ;;  %s491_s27 = smov [#allocation5]   ;;  %s36_s26 = int_to_ptr.hbm [resolvable:$true] %s35_s26 }
   0x5   :  { %s37_s28 = sshll.u32 %s491_s27, 4  ;;  %s22_s8 = sshll.u32 %s571_s0, 4  ;;  %s38_s28 = int_to_ptr.vmem [resolvable:$true] %s37_s28  ;;  %s23_s8 = int_to_ptr.hbm [resolvable:$true] %s22_s8 }
   0x6   :  { %s492_s9 = smov 128   ;;  %s493_s10 = smov 8  }
   0x7   :  { %43 = dma.hbm_to_vmem [thread:$0]  %s36_s26, 256, %s38_s28, [#allocation6], %s492_s9, %s492_s9, %s493_s10  }
   0x8   :  { %s494_s11 = smov [#allocation2]   ;;  %s48_s15 = sshll.u32 %s573_s2, 4  ;;  %s49_s15 = int_to_ptr.hbm [resolvable:$true] %s48_s15 }
   0x9   :  { %s24_s12 = sshll.u32 %s494_s11, 4  ;;  %s495_s1 = smov [#allocation7]   ;;  %s25_s12 = int_to_ptr.vmem [resolvable:$true] %s24_s12 }
   0xa   :  { %30 = dma.hbm_to_vmem [thread:$0]  %s23_s8, 256, %s25_s12, [#allocation3], %s492_s9, %s492_s9, %s493_s10  }
   0xb   :  { %s50_s16 = sshll.u32 %s495_s1, 4  ;;  %s61_s0 = sshll.u32 %s574_s3, 4  ;;  %s51_s16 = int_to_ptr.vmem [resolvable:$true] %s50_s16  ;;  %s62_s0 = int_to_ptr.hbm [resolvable:$true] %s61_s0 }
   0xc   :  { %s496_s19 = smov 64   ;;  %s497_s20 = smov 4  }
   0xd   :  { %56 = dma.hbm_to_vmem [thread:$0]  %s49_s15, 512, %s51_s16, [#allocation6], %s496_s19, %s496_s19, %s497_s20  }
   0xe   :  { %s498_s21 = smov [#allocation8]  }
   0xf   :  { %s63_s22 = sshll.u32 %s498_s21, 4  ;;  %s64_s22 = int_to_ptr.vmem [resolvable:$true] %s63_s22 }
  0x10   :  { %69 = dma.hbm_to_vmem [thread:$0]  %s62_s0, 512, %s64_s22, [#allocation9], %s496_s19, %s496_s19, %s497_s20  }
  0x11   :  { %481 = dma.done.wait [#allocation3], 256  }
  0x12   :  { %482 = vsyncadd [#allocation3], 4294967040 }
  0x13   :  { %483 = dma.done.wait [#allocation6], 768  }
  0x14   :  { %484 = vsyncadd [#allocation6], 4294966528 }
  0x15   :  { %485 = dma.done.wait [#allocation9], 512  }
  0x16   :  { %486 = vsyncadd [#allocation9], 4294966784  ;;  %v320_v0 = vld [vmem:[#allocation7 + $0x18] sm:$0xff]  ;;  %v318_v1 = vld [vmem:[#allocation7 + $0x8] sm:$0xff]  ;;  %vm117_vm0 = vcmask 261120   ;;  %s499_s23 = smov [#allocation10]  }
  0x17   :  { %v324_v2 = vld [vmem:[#allocation8 + $0x18] sm:$0xff]  ;;  %v322_v3 = vld [vmem:[#allocation8 + $0x8] sm:$0xff]  ;;  %v319_v4 = vld [vmem:[#allocation7 + $0x10] sm:$0xff]  ;;  %127 = vmatpush.bf16.msra.mxu0 %v320_v0  ;;  %155 = vmatpush.bf16.msra.mxu1 %v318_v1  ;;  %s251_s24 = sshll.u32 %s499_s23, 4  ;;  %s253_s27 = sshll.u32 %s577_s6, 4  ;;  %s252_s24 = int_to_ptr.vmem [resolvable:$true] %s251_s24  ;;  %s254_s27 = int_to_ptr.hbm [resolvable:$true] %s253_s27 }
  0x18   :  { %v317_v5 = vld [vmem:[#allocation7] sm:$0xff]  ;;  %v323_v6 = vld [vmem:[#allocation8 + $0x10] sm:$0xff]  ;;  %v98_v8 = vld [vmem:[#allocation2 + $0x8] sm:$0xff]  ;;  %204 = vmatpush.bf16.msra.mxu2 %v324_v2  ;;  %232 = vmatpush.bf16.msra.mxu3 %v322_v3  ;;  %s264_s9 = sshll.u32 %s578_s7, 4  ;;  %s265_s9 = int_to_ptr.hbm [resolvable:$true] %s264_s9 }
  0x19   :  { %v321_v7 = vld [vmem:[#allocation8] sm:$0xff]  ;;  %v176_v10 = vld [vmem:[#allocation5 + $0x8] sm:$0xff]  ;;  %v169_v11 = vld [vmem:[#allocation5] sm:$0xff]  ;;  %v99_v12 = vpack.c.bf16 %v98_v8, %v98_v8 }
  0x1a   :  { %v91_v9 = vld [vmem:[#allocation2] sm:$0xff]  ;;  %v177_v14 = vpack.c.bf16 %v176_v10, %v176_v10  ;;  %v170_v15 = vpack.c.bf16 %v169_v11, %v169_v11 }
  0x1b   :  { %v92_v13 = vpack.c.bf16 %v91_v9, %v91_v9  ;;  %128 = vmatpush.bf16.msra.mxu0 %v319_v4  ;;  %156 = vmatpush.bf16.msra.mxu1 %v317_v5  ;;  %v335_v16 = vld [vmem:[%s575_s4] ss:$0 sm:$0xff]  ;;  %s500_s4 = smov [#allocation11]  }
  0x1c   :  { %205 = vmatpush.bf16.msra.mxu2 %v323_v6  ;;  %233 = vmatpush.bf16.msra.mxu3 %v321_v7  ;;  %v336_v22 = vld [vmem:[%s576_s5] ss:$0 sm:$0xff]  ;;  %s262_s30 = sshll.u32 %s500_s4, 4  ;;  %s263_s30 = int_to_ptr.vmem [resolvable:$true] %s262_s30 }
  0x1e   :  { %289 = vmatmul.msk.bf16.vlgmr.msra.gmra.mxu0 %vm117_vm0, %v99_v12  ;;  %298 = vmatmul.msk.bf16.vlgmr.msra.gmra.mxu1 %vm117_vm0, %v92_v13 }
  0x1f   :  { %307 = vmatmul.msk.bf16.vlgmr.msra.gmra.mxu2 %vm117_vm0, %v177_v14  ;;  %316 = vmatmul.msk.bf16.vlgmr.msra.gmra.mxu3 %vm117_vm0, %v170_v15 }
  0x9b   :  { %v130_v17 = vpop.f32.mrf.mxu0  ;;  %v158_v18 = vpop.f32.mrf.mxu1 }
  0x9c   :  { %v159_v19 = vadd.f32 %v158_v18, %v130_v17 }
  0x9e   :  { %v166_v20 = vadd.f32 %v335_v16, %v159_v19 }
  0xa0   :  { %v167_v21 = vmax.f32 %v166_v20, 0.0 }
  0xa2   :  { %168 = vst.msk [vmem:[#allocation10] sm:$0xff] %vm117_vm0, %v167_v21  ;;  %v207_v23 = vpop.f32.mrf.mxu2  ;;  %v235_v24 = vpop.f32.mrf.mxu3 }
  0xa3   :  { %v236_v25 = vadd.f32 %v235_v24, %v207_v23  ;;  %v132_v26 = vpop.f32.mrf.mxu0  ;;  %v160_v27 = vpop.f32.mrf.mxu1  ;;  %256 = dma.vmem_to_hbm [thread:$0]  %s252_s24, 128, %s254_s27, [#allocation4]  }
  0xa5   :  { %v243_v28 = vadd.f32 %v336_v22, %v236_v25 }
  0xa7   :  { %v244_v29 = vmax.f32 %v243_v28, 0.0 }
  0xa9   :  { %245 = vst.msk [vmem:[#allocation11] sm:$0xff] %vm117_vm0, %v244_v29 }
  0xaa   :  { %v209_v30 = vpop.f32.mrf.mxu2  ;;  %v237_v31 = vpop.f32.mrf.mxu3  ;;  %267 = dma.vmem_to_hbm [thread:$0]  %s263_s30, 128, %s265_s9, [#allocation12]  }
  0xab   :  { %487 = dma.done.wait [#allocation4], 128  }
  0xac   :  { %488 = vsyncadd [#allocation4], 4294967168 }
  0xad   :  { %489 = dma.done.wait [#allocation12], 128  }
  0xae   :  { %490 = vsyncadd [#allocation12], 4294967168 }
  0xaf   :  { %276 = vsyncpa [#allocation3], 1 }
  0xb0   :  { %277 = vsyncpa [#allocation6], 1 }
  0xb1   :  { %278 = vsyncpa [#allocation9], 1 }
  0xb2   :  { %279 = vsyncpa [#allocation4], 1 }
  0xb3   :  { %280 = vsyncpa [#allocation12], 1 }

</bundles_post_ra>
